<compile_context>
chip_gen: v7x
topology: tpu7x:2x2x1
jax: 0.10.0
libtpu: 0.0.40
codegen_flags: <defaults>
</compile_context>

<pallas_src>
import functools

import jax
import jax.numpy as jnp
from jax.experimental import pallas as pl
from jax.experimental.pallas import tpu as pltpu


def _round_up(a, b):
    return -(-a // b) * b


def _gated_attention_kernel(x_ref, wlr_ref, blr_ref, wlast_ref, blast_ref,
                            attn_ref, scores_ref, *, embed_dim):
    x = x_ref[...]                                            # (T, D)

    # Fused left/right linear: one MXU pass, f32 accumulation.
    h = jnp.dot(x, wlr_ref[...], preferred_element_type=jnp.float32)
    h = h + blr_ref[...]                                      # (T, 2E)
    left = jnp.tanh(h[:, :embed_dim])                         # (T, E)
    right = jax.nn.sigmoid(h[:, embed_dim:])                  # (T, E)
    gated = left * right                                      # (T, E)

    # Final projection to one logit per row, computed transposed so the result is
    # already lane-major: (1, E) . (T, E)^T -> (1, T).  Avoids both an N=1 matmul
    # output and a sublane->lane relayout of the per-row scores.
    scores = jax.lax.dot_general(
        wlast_ref[...], gated,
        dimension_numbers=(((1,), (1,)), ((), ())),
        preferred_element_type=jnp.float32) + blast_ref[...]  # (1, T)
    scores_ref[...] = scores.astype(scores_ref.dtype)

    # softmax over the original size-1 last axis: max(s) == s and the single-term
    # sum is exp(0), so it folds to exp(s - s) == 1.0 (keeps the data dependence
    # instead of writing a constant).
    attn_ref[...] = jnp.exp(scores - scores).astype(attn_ref.dtype)


@functools.partial(jax.jit,
                   static_argnames=("tile_rows", "use_bf16", "return_scores"))
def gated_attention_block(x, params, *, tile_rows=512, use_bf16=False,
                          return_scores=False):
    """x: (batch, seq, input_dim) -> attention_map: (batch, seq, 1)."""
    wl, bl, wr, br, wlast, blast = params
    batch, seq, input_dim = x.shape
    embed_dim = wl.shape[1]
    rows = batch * seq

    # Big, lane-aligned row tiles; pad rows to a whole number of tiles.
    tile = max(128, _round_up(min(tile_rows, rows), 128))
    rows_padded = _round_up(rows, tile)
    num_tiles = rows_padded // tile

    x2d = x.reshape(rows, input_dim)
    if rows_padded != rows:
        x2d = jnp.pad(x2d, ((0, rows_padded - rows), (0, 0)))

    # Fuse the left/right projections into one wide matmul.
    wlr = jnp.concatenate([wl, wr], axis=1)                   # (D, 2E)
    blr = jnp.concatenate([bl, br]).reshape(1, 2 * embed_dim)
    wlast_row = wlast.reshape(1, embed_dim)                   # (1, E)
    blast2 = blast.reshape(1, 1)

    if use_bf16:  # v6e / v7x: bf16 MXU inputs, f32 accumulation inside the kernel.
        x2d = x2d.astype(jnp.bfloat16)
        wlr = wlr.astype(jnp.bfloat16)

    kernel = functools.partial(_gated_attention_kernel, embed_dim=embed_dim)

    attn2d, scores2d = pl.pallas_call(
        kernel,
        out_shape=(
            jax.ShapeDtypeStruct((num_tiles, tile), x.dtype),      # attention map
            jax.ShapeDtypeStruct((num_tiles, tile), jnp.float32),  # raw scores
        ),
        grid_spec=pltpu.PrefetchScalarGridSpec(
            num_scalar_prefetch=0,
            grid=(num_tiles,),
            in_specs=[
                pl.BlockSpec((tile, input_dim), lambda i: (i, 0)),          # x
                pl.BlockSpec((input_dim, 2 * embed_dim), lambda i: (0, 0)),  # Wlr
                pl.BlockSpec((1, 2 * embed_dim), lambda i: (0, 0)),         # blr
                pl.BlockSpec((1, embed_dim), lambda i: (0, 0)),             # Wlast
                pl.BlockSpec((1, 1), lambda i: (0, 0)),                     # blast
            ],
            out_specs=[
                pl.BlockSpec((1, tile), lambda i: (i, 0)),   # lane-dense rows
                pl.BlockSpec((1, tile), lambda i: (i, 0)),
            ],
        ),
        compiler_params=pltpu.CompilerParams(
            dimension_semantics=("parallel",),
            vmem_limit_bytes=64 * 1024 * 1024),
    )(x2d, wlr, blr, wlast_row, blast2)

    attn = attn2d.reshape(rows_padded)[:rows].reshape(batch, seq, 1)
    if return_scores:
        scores = scores2d.reshape(rows_padded)[:rows].reshape(batch, seq, 1)
        return attn, scores
    return attn


def init_params(key, input_dim, embed_dim):
    """nn.Linear-style init; weights stored pre-transposed (in_features, out)."""
    ks = jax.random.split(key, 6)
    s_in = 1.0 / jnp.sqrt(input_dim)
    s_emb = 1.0 / jnp.sqrt(embed_dim)
    wl = jax.random.uniform(ks[0], (input_dim, embed_dim), jnp.float32, -s_in, s_in)
    bl = jax.random.uniform(ks[1], (embed_dim,), jnp.float32, -s_in, s_in)
    wr = jax.random.uniform(ks[2], (input_dim, embed_dim), jnp.float32, -s_in, s_in)
    br = jax.random.uniform(ks[3], (embed_dim,), jnp.float32, -s_in, s_in)
    wlast = jax.random.uniform(ks[4], (embed_dim, 1), jnp.float32, -s_emb, s_emb)
    blast = jax.random.uniform(ks[5], (1,), jnp.float32, -s_emb, s_emb)
    return wl, bl, wr, br, wlast, blast


def reference(x, params):
    wl, bl, wr, br, wlast, blast = params
    hp = jax.lax.Precision.HIGHEST
    right = jax.nn.sigmoid(jnp.dot(x, wr, precision=hp) + br)
    left = jnp.tanh(jnp.dot(x, wl, precision=hp) + bl)
    scores = jnp.dot(right * left, wlast, precision=hp) + blast
    return jax.nn.softmax(scores, axis=-1), scores


if __name__ == "__main__":
    key = jax.random.PRNGKey(0)
    k_x, k_p = jax.random.split(key)

    batch, seq, input_dim, embed_dim = 2, 8, 32, 32
    x = jax.random.normal(k_x, (batch, seq, input_dim), jnp.float32)
    params = init_params(k_p, input_dim, embed_dim)

    attn, scores = gated_attention_block(x, params, return_scores=True)
    attn = jax.block_until_ready(attn)
    scores = jax.block_until_ready(scores)

    ref_attn, ref_scores = reference(x, params)
    assert attn.shape == (batch, seq, 1)
    assert jnp.allclose(attn, ref_attn, atol=1e-6), "attention map mismatch"
    assert jnp.allclose(scores, ref_scores, atol=2e-2, rtol=2e-2), "scores mismatch"

    print("KERNEL_OK")
</pallas_src>

<mosaic_0001>
module attributes {stable_mosaic.version = 11 : i64} {
  func.func @_gated_attention_kernel(%arg0: i32, %arg1: memref<128x32xf32, #tpu.memory_space<vmem>>, %arg2: memref<32x64xf32, #tpu.memory_space<vmem>>, %arg3: memref<1x64xf32, #tpu.memory_space<vmem>>, %arg4: memref<1x32xf32, #tpu.memory_space<vmem>>, %arg5: memref<1x1xf32, #tpu.memory_space<vmem>>, %arg6: memref<1x128xf32, #tpu.memory_space<vmem>>, %arg7: memref<1x128xf32, #tpu.memory_space<vmem>>) attributes {dimension_semantics = [#tpu.dimension_semantics<parallel>], iteration_bounds = array<i64: 1>, scalar_prefetch = 0 : i64, scratch_operands = 0 : i64, tpu.core_type = #tpu.core_type<tc>, window_params = [{transform_indices = @transform_0, window_bounds = array<i64: 128, 32>}, {pipeline_mode = #tpu.pipeline_mode<synchronous>, transform_indices = @transform_1, window_bounds = array<i64: 32, 64>}, {pipeline_mode = #tpu.pipeline_mode<synchronous>, transform_indices = @transform_2, window_bounds = array<i64: 1, 64>}, {pipeline_mode = #tpu.pipeline_mode<synchronous>, transform_indices = @transform_3, window_bounds = array<i64: 1, 32>}, {pipeline_mode = #tpu.pipeline_mode<synchronous>, transform_indices = @transform_4, window_bounds = array<i64: 1, 1>}, {transform_indices = @transform_5, window_bounds = array<i64: 1, 128>}, {transform_indices = @transform_6, window_bounds = array<i64: 1, 128>}]} {
    %c0 = arith.constant 0 : index
    %c0_0 = arith.constant 0 : index
    %0 = vector.load %arg1[%c0, %c0_0] : memref<128x32xf32, #tpu.memory_space<vmem>>, vector<128x32xf32>
    %c0_1 = arith.constant 0 : index
    %c0_2 = arith.constant 0 : index
    %1 = vector.load %arg2[%c0_1, %c0_2] : memref<32x64xf32, #tpu.memory_space<vmem>>, vector<32x64xf32>
    %cst = arith.constant dense<0.000000e+00> : vector<128x64xf32>
    %2 = tpu.matmul %0, %1, %cst {dimension_numbers = #tpu.dot_dimension_numbers<[1], [0], [0], [1], [0, 0, 1, 1], [], []>} : vector<128x32xf32>, vector<32x64xf32>, vector<128x64xf32> -> vector<128x64xf32>
    %c0_3 = arith.constant 0 : index
    %c0_4 = arith.constant 0 : index
    %3 = vector.load %arg3[%c0_3, %c0_4] : memref<1x64xf32, #tpu.memory_space<vmem>>, vector<1x64xf32>
    %4 = vector.broadcast %3 : vector<1x64xf32> to vector<128x64xf32>
    %5 = arith.addf %2, %4 : vector<128x64xf32>
    %6 = vector.extract_strided_slice %5 {offsets = [0, 0], sizes = [128, 32], strides = [1, 1]} : vector<128x64xf32> to vector<128x32xf32>
    %7 = math.tanh %6 : vector<128x32xf32>
    %8 = vector.extract_strided_slice %5 {offsets = [0, 32], sizes = [128, 32], strides = [1, 1]} : vector<128x64xf32> to vector<128x32xf32>
    %9 = arith.negf %8 : vector<128x32xf32>
    %10 = math.exp %9 : vector<128x32xf32>
    %cst_5 = arith.constant 1.000000e+00 : f32
    %11 = vector.broadcast %cst_5 : f32 to vector<128x32xf32>
    %12 = arith.addf %11, %10 : vector<128x32xf32>
    %13 = arith.divf %11, %12 : vector<128x32xf32>
    %14 = arith.mulf %7, %13 : vector<128x32xf32>
    %c0_6 = arith.constant 0 : index
    %c0_7 = arith.constant 0 : index
    %15 = vector.load %arg4[%c0_6, %c0_7] : memref<1x32xf32, #tpu.memory_space<vmem>>, vector<1x32xf32>
    %cst_8 = arith.constant dense<0.000000e+00> : vector<1x128xf32>
    %16 = tpu.matmul %15, %14, %cst_8 {dimension_numbers = #tpu.dot_dimension_numbers<[1], [1], [0], [0], [0, 0, 1, 0], [], []>} : vector<1x32xf32>, vector<128x32xf32>, vector<1x128xf32> -> vector<1x128xf32>
    %c0_9 = arith.constant 0 : index
    %c0_10 = arith.constant 0 : index
    %17 = vector.load %arg5[%c0_9, %c0_10] : memref<1x1xf32, #tpu.memory_space<vmem>>, vector<1x1xf32>
    %18 = vector.broadcast %17 : vector<1x1xf32> to vector<1x128xf32>
    %19 = arith.addf %16, %18 : vector<1x128xf32>
    %c0_11 = arith.constant 0 : index
    %c0_12 = arith.constant 0 : index
    %20 = vector.load %arg7[%c0_11, %c0_12] : memref<1x128xf32, #tpu.memory_space<vmem>>, vector<1x128xf32>
    tpu.vector_store %arg7[%c0_11, %c0_12], %19 {strides = array<i32>} : memref<1x128xf32, #tpu.memory_space<vmem>>, vector<1x128xf32>,
    %21 = arith.subf %19, %19 : vector<1x128xf32>
    %22 = math.exp %21 : vector<1x128xf32>
    %c0_13 = arith.constant 0 : index
    %c0_14 = arith.constant 0 : index
    %23 = vector.load %arg6[%c0_13, %c0_14] : memref<1x128xf32, #tpu.memory_space<vmem>>, vector<1x128xf32>
    tpu.vector_store %arg6[%c0_13, %c0_14], %22 {strides = array<i32>} : memref<1x128xf32, #tpu.memory_space<vmem>>, vector<1x128xf32>,
    return
  }
  func.func @transform_0(%arg0: i32) -> (i32, i32) {
    %c0_i32 = arith.constant 0 : i32
    %c0_i32_0 = arith.constant 0 : i32
    return %arg0, %c0_i32 : i32, i32
  }
  func.func @transform_1(%arg0: i32) -> (i32, i32) {
    %c0_i32 = arith.constant 0 : i32
    %c0_i32_0 = arith.constant 0 : i32
    %c0_i32_1 = arith.constant 0 : i32
    return %c0_i32, %c0_i32_0 : i32, i32
  }
  func.func @transform_2(%arg0: i32) -> (i32, i32) {
    %c0_i32 = arith.constant 0 : i32
    %c0_i32_0 = arith.constant 0 : i32
    %c0_i32_1 = arith.constant 0 : i32
    return %c0_i32, %c0_i32_0 : i32, i32
  }
  func.func @transform_3(%arg0: i32) -> (i32, i32) {
    %c0_i32 = arith.constant 0 : i32
    %c0_i32_0 = arith.constant 0 : i32
    %c0_i32_1 = arith.constant 0 : i32
    return %c0_i32, %c0_i32_0 : i32, i32
  }
  func.func @transform_4(%arg0: i32) -> (i32, i32) {
    %c0_i32 = arith.constant 0 : i32
    %c0_i32_0 = arith.constant 0 : i32
    %c0_i32_1 = arith.constant 0 : i32
    return %c0_i32, %c0_i32_0 : i32, i32
  }
  func.func @transform_5(%arg0: i32) -> (i32, i32) {
    %c0_i32 = arith.constant 0 : i32
    %c0_i32_0 = arith.constant 0 : i32
    return %arg0, %c0_i32 : i32, i32
  }
  func.func @transform_6(%arg0: i32) -> (i32, i32) {
    %c0_i32 = arith.constant 0 : i32
    %c0_i32_0 = arith.constant 0 : i32
    return %arg0, %c0_i32 : i32, i32
  }
}

</mosaic_0001>

<bundles_post_ra>
// kernel: gated_attention_block.1
= control target key start
LH: loop header
LB: loop body
LE: loop exit
PB: predicated region body
PF: predicated region fallthrough
CT: control target
= control target key end

     0   :  { %s1381_s0 = inlined_call_operand.hbm [shape: f32[128,32], index: 0, kind: input, shape index: {}]   ;;  %s1382_s1 = inlined_call_operand.hbm [shape: f32[32,64], index: 1, kind: input, shape index: {}]   ;;  %s1383_s2 = inlined_call_operand.hbm [shape: f32[1,64], index: 2, kind: input, shape index: {}]   ;;  %s1384_s3 = inlined_call_operand.hbm [shape: f32[1,32], index: 3, kind: input, shape index: {}]   ;;  %s1385_s4 = inlined_call_operand.<no memory space> [shape: f32[1,1], index: 4, kind: input, shape index: {}]   ;;  %s1386_s5 = inlined_call_operand.hbm [shape: f32[1,128], index: 5, kind: output, shape index: {0}]   ;;  %s1387_s6 = inlined_call_operand.hbm [shape: f32[1,128], index: 6, kind: output, shape index: {1}]  }
   0x1   :  { %v12_v0 = vstv %s1385_s4 }
   0x2   :  { %13 = vst [vmem:[#allocation2] sm:$0x1] %v12_v0 }
   0x3   :  { %14 = vsyncpa [#allocation4], 0 }
   0x4   :  { %15 = vsyncpa [#allocation7], 0 }
   0x5   :  { %16 = vsyncpa [#allocation10], 0 }
   0x6   :  { %17 = vsyncpa [#allocation5], 0 }
   0x7   :  { %18 = vsyncpa [#allocation13], 0  ;;  %s1106_s23 = smov [#allocation6]   ;;  %s1107_s25 = smov [#allocation3]  }
   0x8   :  { %s36_s24 = sshll.u32 %s1106_s23, 4  ;;  %s24_s26 = sshll.u32 %s1107_s25, 4  ;;  %s37_s24 = int_to_ptr.vmem [resolvable:$true] %s36_s24  ;;  %s1157_s26 = int_to_ptr.vmem [resolvable:$true] %s24_s26 }
   0x9   :  { %s964_s29 = scalar_lea.hbm %s1382_s1, 512 }
   0xa   :  { %p965_p0 = scmp.ne.s32.totalorder %s1382_s1, %s964_s29  ;;  %p968_p1 = scmp.lt.u32.totalorder %s964_s29, %s1382_s1 }
   0xc   :  { %p970_p2 = pnand %p968_p1, %p965_p0 }
   0xe   :  { %973 = shalt.err (!%p970_p2)
}
   0xf   :  { %s974_s9 = scalar_lea.vmem %s37_s24, 512  ;;  %p979_p4 = scmp.lt.s32.totalorder %s37_s24, %s37_s24 }
  0x10   :  { %p975_p3 = scmp.ne.s32.totalorder %s37_s24, %s974_s9  ;;  %p980_p5 = scmp.lt.s32.totalorder %s974_s9, %s974_s9 }
  0x12   :  { %p981_p6 = por %p980_p5, %p979_p4 }
  0x14   :  { %p982_p7 = pnand %p981_p6, %p975_p3 }
  0x16   :  { %985 = shalt.err (!%p982_p7)
}
  0x17   :  { %s1108_s10 = smov 128   ;;  %s1109_s11 = smov 8  }
  0x18   :  { %42 = dma.hbm_to_vmem [thread:$0]  %s1382_s1, 512, %s37_s24, [#allocation7], %s1108_s10, %s1108_s10, %s1109_s11  }
  0x19   :  { %s986_s16 = scalar_lea.hbm %s1381_s0, 2048 }
  0x1a   :  { %p987_p8 = scmp.ne.s32.totalorder %s1381_s0, %s986_s16  ;;  %p990_p9 = scmp.lt.u32.totalorder %s986_s16, %s1381_s0 }
  0x1c   :  { %p992_p10 = pnand %p990_p9, %p987_p8 }
  0x1e   :  { %995 = shalt.err (!%p992_p10)
}
  0x1f   :  { %s996_s21 = scalar_lea.vmem %s1157_s26, 2048  ;;  %p1001_p12 = scmp.lt.s32.totalorder %s1157_s26, %s1157_s26 }
  0x20   :  { %p997_p11 = scmp.ne.s32.totalorder %s1157_s26, %s996_s21  ;;  %p1002_p13 = scmp.lt.s32.totalorder %s996_s21, %s996_s21 }
  0x22   :  { %p1003_p0 = por %p1002_p13, %p1001_p12 }
  0x24   :  { %p1004_p1 = pnand %p1003_p0, %p997_p11 }
  0x26   :  { %1007 = shalt.err (!%p1004_p1)
}
  0x27   :  { %30 = dma.hbm_to_vmem [thread:$0]  %s1381_s0, 2048, %s1157_s26, [#allocation4], %s1108_s10, %s1108_s10, %s1109_s11  }
  0x28   :  { %s1110_s23 = smov [#allocation8]   ;;  %s1111_s25 = smov [#allocation9]  }
  0x29   :  { %s49_s24 = sshll.u32 %s1110_s23, 4  ;;  %s59_s27 = sshll.u32 %s1111_s25, 4  ;;  %s50_s24 = int_to_ptr.vmem [resolvable:$true] %s49_s24  ;;  %s60_s27 = int_to_ptr.vmem [resolvable:$true] %s59_s27 }
  0x2a   :  { %s1008_s30 = scalar_lea.hbm %s1383_s2, 16 }
  0x2b   :  { %p1009_p2 = scmp.ne.s32.totalorder %s1383_s2, %s1008_s30  ;;  %p1012_p3 = scmp.lt.u32.totalorder %s1008_s30, %s1383_s2 }
  0x2d   :  { %p1014_p4 = pnand %p1012_p3, %p1009_p2 }
  0x2f   :  { %1017 = shalt.err (!%p1014_p4)
}
  0x30   :  { %s1018_s0 = scalar_lea.vmem %s50_s24, 16  ;;  %s1022_s26 = scalar_lea.vmem %s50_s24, 32 }
  0x31   :  { %p1019_p5 = scmp.ne.s32.totalorder %s50_s24, %s1018_s0  ;;  %p1023_p6 = scmp.lt.s32.totalorder %s50_s24, %s50_s24 }
  0x32   :  { %p1024_p7 = scmp.lt.s32.totalorder %s1022_s26, %s1018_s0 }
  0x34   :  { %p1025_p8 = por %p1024_p7, %p1023_p6 }
  0x36   :  { %p1026_p9 = pnand %p1025_p8, %p1019_p5 }
  0x38   :  { %1029 = shalt.err (!%p1026_p9)
}
  0x39   :  { %52 = dma.hbm_to_vmem [thread:$0]  %s1383_s2, 16, %s50_s24, [#allocation7]  }
  0x3a   :  { %s1030_s14 = scalar_lea.hbm %s1384_s3, 16 }
  0x3b   :  { %p1031_p10 = scmp.ne.s32.totalorder %s1384_s3, %s1030_s14  ;;  %p1034_p11 = scmp.lt.u32.totalorder %s1030_s14, %s1384_s3 }
  0x3d   :  { %p1036_p12 = pnand %p1034_p11, %p1031_p10 }
  0x3f   :  { %1039 = shalt.err (!%p1036_p12)
}
  0x40   :  { %s1040_s19 = scalar_lea.vmem %s60_s27, 16  ;;  %s1044_s20 = scalar_lea.vmem %s60_s27, 32 }
  0x41   :  { %p1041_p13 = scmp.ne.s32.totalorder %s60_s27, %s1040_s19  ;;  %p1045_p0 = scmp.lt.s32.totalorder %s60_s27, %s60_s27 }
  0x42   :  { %p1046_p1 = scmp.lt.s32.totalorder %s1044_s20, %s1040_s19 }
  0x44   :  { %p1047_p2 = por %p1046_p1, %p1045_p0 }
  0x46   :  { %p1048_p3 = pnand %p1047_p2, %p1041_p13 }
  0x48   :  { %1051 = shalt.err (!%p1048_p3)
}
  0x49   :  { %62 = dma.hbm_to_vmem [thread:$0]  %s1384_s3, 16, %s60_s27, [#allocation10]  }
  0x4a   :  { %1096 = dma.done.wait [#allocation4], 2048  }
  0x4b   :  { %1097 = vsyncadd [#allocation4], 4294965248 }
  0x4c   :  { %1098 = dma.done.wait [#allocation7], 528  }
  0x4d   :  { %1099 = vsyncadd [#allocation7], 4294966768 }
  0x4e   :  { %1100 = dma.done.wait [#allocation10], 16  }
  0x4f   :  { %1101 = vsyncadd [#allocation10], 4294967280  ;;  %vm104_vm0 = vcmask 261120   ;;  %v93_v1 = vld [vmem:[#allocation6] sm:$0xff]  ;;  %v94_v2 = vld [vmem:[#allocation6 + $0x8] sm:$0xff]  ;;  %s1113_s3 = smov 96  }
  0x50   :  { %v95_v3 = vld [vmem:[#allocation6 + $0x10] sm:$0xff]  ;;  %v812_v4 = vpack.c.bf16 %v94_v2, %v93_v1  ;;  %v96_v5 = vld [vmem:[#allocation6 + $0x18] sm:$0xff]  ;;  %v77_v6 = vld [vmem:[#allocation3] sm:$0xff]  ;;  %vm1114_vm1 = vmmov 0   ;;  %s1117_s1 = smov [#allocation12]  }
  0x51   :  { %v816_v7 = vpack.c.bf16 %v96_v5, %v95_v3  ;;  %753 = vmatprep.mubr.msk.f32.mxu0 %vm104_vm0, %v77_v6  ;;  %v78_v8 = vld [vmem:[#allocation3 + $0x8] sm:$0xff]  ;;  %v79_v9 = vld [vmem:[#allocation3 + $0x10] sm:$0xff]  ;;  %v80_v10 = vld [vmem:[#allocation3 + $0x18] sm:$0xff]  ;;  %s643_s22 = sshll.u32 %s1117_s1, 4  ;;  %s644_s22 = int_to_ptr.vmem [resolvable:$true] %s643_s22 }
  0x52   :  { %813 = vmatprep.subr.bf16.mxu0 %v812_v4  ;;  %v81_v11 = vld [vmem:[#allocation3 + $0x20] sm:$0xff]  ;;  %v82_v12 = vld [vmem:[#allocation3 + $0x28] sm:$0xff]  ;;  %v83_v13 = vld [vmem:[#allocation3 + $0x30] sm:$0xff]  ;;  %s1052_s23 = scalar_lea.vmem %s644_s22, 16  ;;  %s1056_s24 = scalar_lea.vmem %s644_s22, 32 }
  0x53   :  { %815 = vmatpush3.bf16.msra.mxu0 %v812_v4  ;;  %v84_v14 = vld [vmem:[#allocation3 + $0x38] sm:$0xff]  ;;  %v85_v15 = vld [vmem:[#allocation3 + $0x40] sm:$0xff]  ;;  %v86_v16 = vld [vmem:[#allocation3 + $0x48] sm:$0xff]  ;;  %v1112_v4 = vmov 0.0|0.0   ;;  %p1053_p4 = scmp.ne.s32.totalorder %s644_s22, %s1052_s23  ;;  %p1057_p5 = scmp.lt.s32.totalorder %s644_s22, %s644_s22 }
  0x54   :  { %817 = vmatprep.subr.bf16.mxu0 %v816_v7  ;;  %v87_v17 = vld [vmem:[#allocation3 + $0x50] sm:$0xff]  ;;  %v88_v18 = vld [vmem:[#allocation3 + $0x58] sm:$0xff]  ;;  %v89_v19 = vld [vmem:[#allocation3 + $0x60] sm:$0xff]  ;;  %820 = vmatprep.subr.bf16.mxu1 %v1112_v4  ;;  %p1058_p6 = scmp.lt.s32.totalorder %s1056_s24, %s1052_s23 }
  0x55   :  { %v90_v20 = vld [vmem:[#allocation3 + $0x68] sm:$0xff]  ;;  %v91_v21 = vld [vmem:[#allocation3 + $0x70] sm:$0xff]  ;;  %v92_v22 = vld [vmem:[#allocation3 + $0x78] sm:$0xff] }
  0x56   :  { %v1228_v23 = vld [vmem:[#allocation8] ss:$0 sm:$0xff]  ;;  %vm1321_vm2 = vmpackc.low %vm104_vm0, %vm104_vm0  ;;  %p1059_p7 = por %p1058_p6, %p1057_p5 }
  0x57   :  { %819 = vmatpush3.bf16.msra.mxu0 %v816_v7 }
  0x58   :  { %p1060_p8 = pnand %p1059_p7, %p1053_p4 }
  0x5a   :  { %754 = vmatmul.mubr.msk.f32.vlgmr.msra.gmra.mrb[0].mxu0 %vm104_vm0, %v78_v8 }
  0x5b   :  { %756 = vmatprep.mubr.msk.f32.mxu0 %vm104_vm0, %v79_v9 }
  0x5e   :  { %757 = vmatmul.mubr.msk.f32.gmra.mrb[2].mxu0 %vm104_vm0, %v80_v10 }
  0x5f   :  { %759 = vmatprep.mubr.msk.f32.mxu0 %vm104_vm0, %v81_v11 }
  0x62   :  { %760 = vmatmul.mubr.msk.f32.gmra.mrb[4].mxu0 %vm104_vm0, %v82_v12 }
  0x63   :  { %762 = vmatprep.mubr.msk.f32.mxu0 %vm104_vm0, %v83_v13 }
  0x66   :  { %763 = vmatmul.mubr.msk.f32.gmra.mrb[6].mxu0 %vm104_vm0, %v84_v14 }
  0x67   :  { %765 = vmatprep.mubr.msk.f32.mxu0 %vm104_vm0, %v85_v15 }
  0x6a   :  { %766 = vmatmul.mubr.msk.f32.gmra.mrb[8].mxu0 %vm104_vm0, %v86_v16 }
  0x6b   :  { %768 = vmatprep.mubr.msk.f32.mxu0 %vm104_vm0, %v87_v17 }
  0x6e   :  { %769 = vmatmul.mubr.msk.f32.gmra.mrb[10].mxu0 %vm104_vm0, %v88_v18 }
  0x6f   :  { %771 = vmatprep.mubr.msk.f32.mxu0 %vm104_vm0, %v89_v19 }
  0x72   :  { %772 = vmatmul.mubr.msk.f32.gmra.mrb[12].mxu0 %vm104_vm0, %v90_v20 }
  0x73   :  { %774 = vmatprep.mubr.msk.f32.mxu0 %vm104_vm0, %v91_v21 }
  0x76   :  { %775 = vmatmul.mubr.msk.f32.gmra.mrb[14].mxu0 %vm104_vm0, %v92_v22 }
 0x12d   :  { %v755_v24 = vpop.f32.mrb[0].mxu0 }
 0x12e   :  { %v1231_v25 = vadd.f32 %v755_v24, %v1228_v23  ;;  %v219_v26 = vpop.f32.mrb[1].mxu0 }
 0x12f   :  { %v1234_v27 = vadd.f32 %v1228_v23, %v219_v26 }
 0x130   :  { %v676_v28 = vmul.f32 -1.442695, %v1231_v25 }
 0x131   :  { %v675_v29 = vmul.f32 -1.442695, %v1234_v27  ;;  %v758_v30 = vpop.f32.mrb[2].mxu0 }
 0x132   :  { %866 = vpow2.f32 %v676_v28  ;;  %v1239_v31 = vadd.f32 %v758_v30, %v1228_v23  ;;  %v229_v32 = vpop.f32.mrb[3].mxu0 }
 0x133   :  { %868 = vpow2.f32 %v675_v29  ;;  %v1242_v33 = vadd.f32 %v1228_v23, %v229_v32 }
 0x134   :  { %v678_v34 = vmul.f32 -1.442695, %v1239_v31 }
 0x135   :  { %v677_v35 = vmul.f32 -1.442695, %v1242_v33  ;;  %v761_v36 = vpop.f32.mrb[4].mxu0 }
 0x136   :  { %870 = vpow2.f32 %v678_v34  ;;  %v1247_v37 = vadd.f32 %v761_v36, %v1228_v23  ;;  %v239_v38 = vpop.f32.mrb[5].mxu0 }
 0x137   :  { %872 = vpow2.f32 %v677_v35  ;;  %v1250_v39 = vadd.f32 %v1228_v23, %v239_v38 }
 0x138   :  { %v680_v40 = vmul.f32 -1.442695, %v1247_v37 }
 0x139   :  { %v679_v41 = vmul.f32 -1.442695, %v1250_v39  ;;  %v764_v42 = vpop.f32.mrb[6].mxu0 }
 0x13a   :  { %874 = vpow2.f32 %v680_v40  ;;  %v1255_v43 = vadd.f32 %v764_v42, %v1228_v23  ;;  %v249_v44 = vpop.f32.mrb[7].mxu0 }
 0x13b   :  { %876 = vpow2.f32 %v679_v41  ;;  %v1258_v45 = vadd.f32 %v1228_v23, %v249_v44 }
 0x13c   :  { %v867_v46 = vpop.eup %866  ;;  %v682_v47 = vmul.f32 -1.442695, %v1255_v43 }
 0x13d   :  { %v869_v48 = vpop.eup %868  ;;  %v681_v49 = vmul.f32 -1.442695, %v1258_v45  ;;  %v767_v50 = vpop.f32.mrb[8].mxu0  ;;  %v363_v54 = vadd.f32 1.0, %v867_v46 }
 0x13e   :  { %v362_v51 = vadd.f32 1.0, %v869_v48  ;;  %878 = vpow2.f32 %v682_v47  ;;  %v1263_v52 = vadd.f32 %v767_v50, %v1228_v23  ;;  %v259_v53 = vpop.f32.mrb[9].mxu0 }
 0x13f   :  { %v1267_v58 = vadd.f32 %v1228_v23, %v259_v53 }
 0x140   :  { %v871_v55 = vpop.eup %870  ;;  %880 = vrcp.f32 %v362_v51  ;;  %v684_v57 = vmul.f32 -1.442695, %v1263_v52 }
 0x141   :  { %v873_v56 = vpop.eup %872  ;;  %882 = vpow2.f32 %v681_v49  ;;  %v770_v59 = vpop.f32.mrb[10].mxu0  ;;  %v365_v60 = vadd.f32 1.0, %v871_v55  ;;  %v683_v2 = vmul.f32 -1.442695, %v1267_v58 }
 0x142   :  { %v364_v61 = vadd.f32 1.0, %v873_v56  ;;  %v269_v62 = vpop.f32.mrb[11].mxu0  ;;  %884 = vrcp.f32 %v363_v54  ;;  %v1270_v0 = vadd.f32 %v770_v59, %v1228_v23 }
 0x143   :  { %v1275_v8 = vadd.f32 %v1228_v23, %v269_v62 }
 0x144   :  { %v875_v63 = vpop.eup %874  ;;  %886 = vrcp.f32 %v364_v61  ;;  %v686_v10 = vmul.f32 -1.442695, %v1270_v0 }
 0x145   :  { %v877_v1 = vpop.eup %876  ;;  %888 = vpow2.f32 %v684_v57  ;;  %v773_v3 = vpop.f32.mrb[12].mxu0  ;;  %v367_v5 = vadd.f32 1.0, %v875_v63  ;;  %v685_v17 = vmul.f32 -1.442695, %v1275_v8 }
 0x146   :  { %890 = vrcp.f32 %v365_v60  ;;  %v366_v6 = vadd.f32 1.0, %v877_v1  ;;  %v279_v7 = vpop.f32.mrb[13].mxu0  ;;  %v1279_v12 = vadd.f32 %v773_v3, %v1228_v23 }
 0x147   :  { %v1284_v19 = vadd.f32 %v1228_v23, %v279_v7  ;;  %v1116_v7 = vmov 0  }
 0x148   :  { %v879_v9 = vpop.eup %878  ;;  %892 = vrcp.f32 %v366_v6  ;;  %v688_v21 = vmul.f32 -1.442695, %v1279_v12  ;;  %v491_v6 = vld [vmem:[#allocation2] sm:$0x1]  ;;  %865 = vset.pattern.permute.xlu0 %v1116_v7 }
 0x149   :  { %v369_v11 = vadd.f32 1.0, %v879_v9  ;;  %894 = vpow2.f32 %v683_v2  ;;  %v776_v13 = vpop.f32.mrb[14].mxu0  ;;  %v687_v30 = vmul.f32 -1.442695, %v1284_v19 }
 0x14a   :  { %v881_v14 = vpop.eup %880  ;;  %896 = vrcp.f32 %v367_v5  ;;  %v289_v15 = vpop.f32.mrb[15].mxu0  ;;  %v1288_v26 = vadd.f32 %v776_v13, %v1228_v23  ;;  %v1115_v5 = vmov 0.0  }
 0x14b   :  { %v883_v16 = vpop.eup %882  ;;  %426 = vrot.lane.b32.xlu0 %v881_v14, %s1113_s3  ;;  %898 = vpow2.f32 %v686_v10  ;;  %v1294_v34 = vadd.f32 %v1228_v23, %v289_v15  ;;  %809 = vmatprep.mubr.msk.f32.mxu1 %vm1114_vm1, %v1115_v5 }
 0x14c   :  { %v368_v18 = vadd.f32 1.0, %v883_v16  ;;  %v885_v20 = vpop.eup %884  ;;  %900 = vrcp.f32 %v369_v11  ;;  %v690_v36 = vmul.f32 -1.442695, %v1288_v26 }
 0x14d   :  { %v689_v42 = vmul.f32 -1.442695, %v1294_v34 }
 0x14e   :  { %v887_v22 = vpop.eup %886  ;;  %902 = vrcp.f32 %v368_v18 }
 0x14f   :  { %v889_v24 = vpop.eup %888  ;;  %904 = vpow2.f32 %v685_v17  ;;  %430 = vrot.lane.b32.xlu1 %v887_v22, %s1113_s3  ;;  %428 = vrot.lane.b32.xlu0 %v885_v20, %s1113_s3 }
 0x150   :  { %v891_v28 = vpop.eup %890  ;;  %v371_v29 = vadd.f32 1.0, %v889_v24  ;;  %906 = vpow2.f32 %v688_v21 }
 0x152   :  { %v893_v32 = vpop.eup %892  ;;  %908 = vrcp.f32 %v371_v29 }
 0x153   :  { %v895_v35 = vpop.eup %894  ;;  %432 = vrot.lane.b32.xlu1 %v891_v28, %s1113_s3  ;;  %434 = vrot.lane.b32.xlu0 %v893_v32, %s1113_s3  ;;  %910 = vpow2.f32 %v687_v30 }
 0x154   :  { %v897_v38 = vpop.eup %896  ;;  %v370_v40 = vadd.f32 1.0, %v895_v35 }
 0x155   :  { %v899_v41 = vpop.eup %898 }
 0x156   :  { %912 = vrcp.f32 %v370_v40  ;;  %v901_v44 = vpop.eup %900  ;;  %v373_v46 = vadd.f32 1.0, %v899_v41 }
 0x157   :  { %914 = vpow2.f32 %v690_v36  ;;  %436 = vrot.lane.b32.xlu1 %v897_v38, %s1113_s3 }
 0x158   :  { %v903_v23 = vpop.eup %902  ;;  %916 = vrcp.f32 %v373_v46 }
 0x159   :  { %v905_v47 = vpop.eup %904  ;;  %438 = vrot.lane.b32.xlu0 %v903_v23, %s1113_s3  ;;  %918 = vpow2.f32 %v689_v42 }
 0x15a   :  { %v372_v48 = vadd.f32 1.0, %v905_v47  ;;  %v907_v49 = vpop.eup %906 }
 0x15b   :  { %440 = vrot.lane.b32.xlu1 %v901_v44, %s1113_s3  ;;  %v375_v51 = vadd.f32 1.0, %v907_v49 }
 0x15c   :  { %v909_v50 = vpop.eup %908  ;;  %920 = vrcp.f32 %v372_v48 }
 0x15d   :  { %v911_v53 = vpop.eup %910  ;;  %922 = vrcp.f32 %v375_v51 }
 0x15e   :  { %v374_v54 = vadd.f32 1.0, %v911_v53 }
 0x15f   :  { %444 = vrot.lane.b32.xlu1 %v909_v50, %s1113_s3 }
 0x160   :  { %v913_v55 = vpop.eup %912  ;;  %924 = vrcp.f32 %v374_v54 }
 0x161   :  { %v915_v56 = vpop.eup %914  ;;  %442 = vrot.lane.b32.xlu0 %v913_v55, %s1113_s3 }
 0x162   :  { %v377_v57 = vadd.f32 1.0, %v915_v56  ;;  %v917_v59 = vpop.eup %916 }
 0x163   :  { %v919_v60 = vpop.eup %918  ;;  %448 = vrot.lane.b32.xlu1 %v917_v59, %s1113_s3 }
 0x164   :  { %926 = vrcp.f32 %v377_v57  ;;  %v376_v61 = vadd.f32 1.0, %v919_v60 }
 0x166   :  { %v921_v62 = vpop.eup %920  ;;  %928 = vrcp.f32 %v376_v61 }
 0x167   :  { %446 = vrot.lane.b32.xlu0 %v921_v62, %s1113_s3  ;;  %v923_v63 = vpop.eup %922  ;;  %930 = vtanh.f32 %v1231_v25 }
 0x168   :  { %452 = vrot.lane.b32.xlu1 %v923_v63, %s1113_s3  ;;  %932 = vtanh.f32 %v1234_v27 }
 0x169   :  { %934 = vtanh.f32 %v1239_v31 }
 0x16a   :  { %v925_v1 = vpop.eup %924  ;;  %936 = vtanh.f32 %v1242_v33 }
 0x16b   :  { %450 = vrot.lane.b32.xlu0 %v925_v1, %s1113_s3  ;;  %938 = vtanh.f32 %v1247_v37  ;;  %v490_v1 = vld [vmem:[#allocation9] sm:$0x1] }
 0x16c   :  { %940 = vtanh.f32 %v1250_v39 }
 0x16d   :  { %942 = vtanh.f32 %v1255_v43 }
 0x16e   :  { %v927_v2 = vpop.eup %926  ;;  %944 = vtanh.f32 %v1258_v45 }
 0x16f   :  { %456 = vrot.lane.b32.xlu1 %v927_v2, %s1113_s3  ;;  %946 = vtanh.f32 %v1263_v52  ;;  %v497_v2 = vlaneseq }
 0x170   :  { %v929_v3 = vpop.eup %928  ;;  %948 = vtanh.f32 %v1267_v58 }
 0x171   :  { %454 = vrot.lane.b32.xlu0 %v929_v3, %s1113_s3  ;;  %v931_v10 = vpop.eup %930  ;;  %950 = vtanh.f32 %v1270_v0  ;;  %v498_v3 = vshrl.u32 %v497_v2, 7 }
 0x172   :  { %v933_v11 = vpop.eup %932  ;;  %952 = vtanh.f32 %v1275_v8 }
 0x173   :  { %v935_v27 = vpop.eup %934  ;;  %954 = vtanh.f32 %v1279_v12  ;;  %v499_v5 = vsub.s32 0, %v498_v3 }
 0x174   :  { %v937_v33 = vpop.eup %936  ;;  %956 = vtanh.f32 %v1284_v19 }
 0x175   :  { %494 = vperm.xlu0 %865, %v491_v6   ;;  %v939_v43 = vpop.eup %938  ;;  %958 = vtanh.f32 %v1288_v26 }
 0x176   :  { %v941_v20 = vpop.eup %940  ;;  %960 = vtanh.f32 %v1294_v34 }
 0x177   :  { %v943_v29 = vpop.eup %942 }
 0x178   :  { %v945_v32 = vpop.eup %944 }
 0x179   :  { %v947_v58 = vpop.eup %946 }
 0x17a   :  { %v949_v42 = vpop.eup %948 }
 0x17b   :  { %v951_v47 = vpop.eup %950 }
 0x17c   :  { %v953_v48 = vpop.eup %952 }
 0x17d   :  { %v955_v51 = vpop.eup %954 }
 0x17e   :  { %v957_v54 = vpop.eup %956 }
 0x17f   :  { %v959_v59 = vpop.eup %958 }
 0x180   :  { %v961_v61 = vpop.eup %960 }
 0x1bd   :  { %v427_v9 = vpop.permute.xlu0 %426 }
 0x1be   :  { %v474_v15 = vmul.f32 %v933_v11, %v427_v9 }
 0x1c1   :  { %v431_v13 = vpop.permute.xlu1 %430  ;;  %v429_v14 = vpop.permute.xlu0 %428 }
 0x1c2   :  { %v475_v16 = vmul.f32 %v931_v10, %v429_v14  ;;  %v476_v17 = vmul.f32 %v937_v33, %v431_v13 }
 0x1c4   :  { %v821_v31 = vpack.c.bf16 %v475_v16, %v474_v15 }
 0x1c5   :  { %v433_v37 = vpop.permute.xlu1 %432  ;;  %v435_v39 = vpop.permute.xlu0 %434 }
 0x1c6   :  { %v477_v18 = vmul.f32 %v935_v27, %v433_v37  ;;  %823 = vmatpush3.bf16.xpose.msk.msra.mxu1 %vm1321_vm2, %v821_v31  ;;  %v478_v22 = vmul.f32 %v941_v20, %v435_v39 }
 0x1c7   :  { %824 = vmatprep.subr.bf16.mxu1 %v1112_v4 }
 0x1c8   :  { %v825_v45 = vpack.c.bf16 %v477_v18, %v476_v17 }
 0x1c9   :  { %v437_v21 = vpop.permute.xlu1 %436 }
 0x1ca   :  { %v479_v24 = vmul.f32 %v939_v43, %v437_v21 }
 0x1cb   :  { %v439_v28 = vpop.permute.xlu0 %438 }
 0x1cc   :  { %v829_v30 = vpack.c.bf16 %v479_v24, %v478_v22  ;;  %v480_v36 = vmul.f32 %v945_v32, %v439_v28 }
 0x1cd   :  { %v441_v35 = vpop.permute.xlu1 %440 }
 0x1ce   :  { %v481_v38 = vmul.f32 %v943_v29, %v441_v35  ;;  %827 = vmatpush3.bf16.xpose.msk.msra.mxu1 %vm1321_vm2, %v825_v45 }
 0x1cf   :  { %828 = vmatprep.subr.bf16.mxu1 %v1112_v4 }
 0x1d0   :  { %v833_v52 = vpack.c.bf16 %v481_v38, %v480_v36 }
 0x1d1   :  { %v445_v40 = vpop.permute.xlu1 %444 }
 0x1d2   :  { %v483_v41 = vmul.f32 %v947_v58, %v445_v40 }
 0x1d3   :  { %v443_v44 = vpop.permute.xlu0 %442 }
 0x1d4   :  { %v482_v0 = vmul.f32 %v949_v42, %v443_v44 }
 0x1d5   :  { %v449_v23 = vpop.permute.xlu1 %448 }
 0x1d6   :  { %v837_v46 = vpack.c.bf16 %v483_v41, %v482_v0  ;;  %831 = vmatpush3.bf16.xpose.msk.msra.mxu1 %vm1321_vm2, %v829_v30  ;;  %v485_v8 = vmul.f32 %v951_v47, %v449_v23 }
 0x1d7   :  { %832 = vmatprep.subr.bf16.mxu1 %v1112_v4 }
 0x1d9   :  { %v447_v49 = vpop.permute.xlu0 %446 }
 0x1da   :  { %v484_v12 = vmul.f32 %v953_v48, %v447_v49  ;;  %v453_v50 = vpop.permute.xlu1 %452 }
 0x1db   :  { %v487_v53 = vmul.f32 %v955_v51, %v453_v50 }
 0x1dc   :  { %v841_v19 = vpack.c.bf16 %v485_v8, %v484_v12 }
 0x1dd   :  { %v451_v55 = vpop.permute.xlu0 %450 }
 0x1de   :  { %835 = vmatpush3.bf16.xpose.msk.msra.mxu1 %vm1321_vm2, %v833_v52  ;;  %v486_v56 = vmul.f32 %v957_v54, %v451_v55 }
 0x1df   :  { %836 = vmatprep.subr.bf16.mxu1 %v1112_v4 }
 0x1e0   :  { %v845_v57 = vpack.c.bf16 %v487_v53, %v486_v56 }
 0x1e1   :  { %v457_v26 = vpop.permute.xlu1 %456 }
 0x1e2   :  { %v489_v60 = vmul.f32 %v959_v59, %v457_v26 }
 0x1e3   :  { %v455_v62 = vpop.permute.xlu0 %454 }
 0x1e4   :  { %v488_v34 = vmul.f32 %v961_v61, %v455_v62 }
 0x1e6   :  { %839 = vmatpush3.bf16.xpose.msk.msra.mxu1 %vm1321_vm2, %v837_v46  ;;  %v849_v63 = vpack.c.bf16 %v489_v60, %v488_v34 }
 0x1e7   :  { %840 = vmatprep.subr.bf16.mxu1 %v1112_v4 }
 0x1ee   :  { %843 = vmatpush3.bf16.xpose.msk.msra.mxu1 %vm1321_vm2, %v841_v19 }
 0x1ef   :  { %844 = vmatprep.subr.bf16.mxu1 %v1112_v4 }
 0x1f4   :  { %v495_v6 = vpop.permute.xlu0 %494 }
 0x1f5   :  { %v500_v7 = vrot.slane %v495_v6, %v499_v5 }
 0x1f6   :  { %847 = vmatpush3.bf16.xpose.msk.msra.mxu1 %vm1321_vm2, %v845_v57 }
 0x1f7   :  { %848 = vmatprep.subr.bf16.mxu1 %v1112_v4 }
 0x1fe   :  { %851 = vmatpush3.bf16.xpose.msk.msra.mxu1 %vm1321_vm2, %v849_v63 }
 0x205   :  { %810 = vmatmul.mubr.msk.f32.vlgmr.msra.gmra.mrb[0].mxu1 %vm104_vm0, %v490_v1 }
 0x2d8   :  { %v618_v9 = vpop.f32.mrb[0].mxu1 }
 0x2d9   :  { %v619_v10 = vadd.f32 %v618_v9, %v500_v7  ;;  %v811_v11 = vpop.f32.mrb[1].mxu1 }
 0x2db   :  { %v623_v13 = vsub.f32 %v619_v10, %v619_v10  ;;  %622 = vst [vmem:[#allocation12] sm:$0x1] %v619_v10 }
 0x2dc   :  { %1063 = shalt.err (!%p1060_p8)
}
 0x2dd   :  { %s1064_s28 = scalar_lea.hbm %s1387_s6, 16 }
 0x2de   :  { %p1065_p9 = scmp.ne.s32.totalorder %s1387_s6, %s1064_s28  ;;  %p1068_p10 = scmp.lt.u32.totalorder %s1064_s28, %s1387_s6 }
 0x2e0   :  { %p1070_p11 = pnand %p1068_p10, %p1065_p9 }
 0x2e2   :  { %1073 = shalt.err (!%p1070_p11)
}
 0x2e3   :  { %646 = dma.vmem_to_hbm [thread:$0]  %s644_s22, 16, %s1387_s6, [#allocation13]   ;;  %v624_v4 = vmul.f32 1.442695, %v623_v13 }
 0x2e4   :  { %s1118_s0 = smov [#allocation11]  }
 0x2e5   :  { %962 = vpow2.f32 %v624_v4  ;;  %s633_s26 = sshll.u32 %s1118_s0, 4  ;;  %s634_s26 = int_to_ptr.vmem [resolvable:$true] %s633_s26 }
 0x2e6   :  { %s1074_s10 = scalar_lea.vmem %s634_s26, 16  ;;  %s1078_s11 = scalar_lea.vmem %s634_s26, 32 }
 0x2e7   :  { %p1075_p12 = scmp.ne.s32.totalorder %s634_s26, %s1074_s10  ;;  %p1079_p13 = scmp.lt.s32.totalorder %s634_s26, %s634_s26 }
 0x2e8   :  { %p1080_p0 = scmp.lt.s32.totalorder %s1078_s11, %s1074_s10 }
 0x2ea   :  { %p1081_p1 = por %p1080_p0, %p1079_p13 }
 0x2ec   :  { %p1082_p2 = pnand %p1081_p1, %p1075_p12 }
 0x2ef   :  { %v963_v14 = vpop.eup %962 }
 0x2f0   :  { %626 = vst [vmem:[#allocation11] sm:$0x1] %v963_v14 }
 0x2f1   :  { %1085 = shalt.err (!%p1082_p2)
}
 0x2f2   :  { %s1086_s14 = scalar_lea.hbm %s1386_s5, 16 }
 0x2f3   :  { %p1087_p3 = scmp.ne.s32.totalorder %s1386_s5, %s1086_s14  ;;  %p1090_p4 = scmp.lt.u32.totalorder %s1086_s14, %s1386_s5 }
 0x2f5   :  { %p1092_p5 = pnand %p1090_p4, %p1087_p3 }
 0x2f7   :  { %1095 = shalt.err (!%p1092_p5)
}
 0x2f8   :  { %636 = dma.vmem_to_hbm [thread:$0]  %s634_s26, 16, %s1386_s5, [#allocation5]  }
 0x2f9   :  { %1102 = dma.done.wait [#allocation5], 16  }
 0x2fa   :  { %1103 = vsyncadd [#allocation5], 4294967280 }
 0x2fb   :  { %1104 = dma.done.wait [#allocation13], 16  }
 0x2fc   :  { %1105 = vsyncadd [#allocation13], 4294967280 }
 0x2fd   :  { %653 = vsyncpa [#allocation4], 1 }
 0x2fe   :  { %654 = vsyncpa [#allocation7], 1 }
 0x2ff   :  { %655 = vsyncpa [#allocation10], 1 }
 0x300   :  { %656 = vsyncpa [#allocation5], 1 }
 0x301   :  { %657 = vsyncpa [#allocation13], 1 }

</bundles_post_ra>
